<compile_context>
chip_gen: v5e
topology: v5e:2x2
jax: 0.10.0
libtpu: 0.0.40
codegen_flags: <defaults>
</compile_context>

<pallas_src>
import functools

import numpy as np
import jax
import jax.numpy as jnp
from jax.experimental import pallas as pl
from jax.experimental.pallas import tpu as pltpu


def _shift_lanes(x, delta):
    """s[:, m] = x[:, (m + delta) % L]  (circular; callers mask out-of-bounds lanes)."""
    L = x.shape[-1]
    d = delta % L
    if d == 0:
        return x
    return jnp.concatenate([x[:, d:], x[:, :d]], axis=-1)


def _convnet_kernel(x_ref, mask_ref, w1_ref, b1_ref, w2_ref, b2_ref,
                    w3_ref, b3_ref, out_ref, *, H, W):
    """Fused conv3x3 -> ReLU -> conv1x1 -> ReLU -> conv3x3 for one image.

    x_ref   : (1, Cin, H*W)      image in channels-major / spatial-on-lanes layout
    mask_ref: (9, H*W)           {0,1} boundary masks per 3x3 tap (dy outer, dx inner)
    w1_ref  : (Chid, 9*Cin)      tap-folded weight matrix of conv1
    w2_ref  : (Chid, Chid)       conv2 (1x1)
    w3_ref  : (Cout, 9*Chid)     tap-folded weight matrix of conv3
    b*_ref  : (C, 1)             bias columns
    out_ref : (1, Cout, H*W)
    """
    x = x_ref[0]  # (Cin, H*W)

    def im2col(z):
        # z: (C, H*W) -> (9*C, H*W); tap order matches the HWIO weight reshape.
        cols = []
        t = 0
        for dy in (-1, 0, 1):
            for dx in (-1, 0, 1):
                s = _shift_lanes(z, dy * W + dx)
                cols.append(s * mask_ref[t:t + 1, :])
                t += 1
        return jnp.concatenate(cols, axis=0)

    xs = im2col(x)                                                       # (9*Cin, HW)
    h1 = jnp.dot(w1_ref[...], xs, preferred_element_type=jnp.float32)
    h1 = jnp.maximum(h1 + b1_ref[...], 0.0)                              # (Chid, HW)
    h2 = jnp.dot(w2_ref[...], h1, preferred_element_type=jnp.float32)
    h2 = jnp.maximum(h2 + b2_ref[...], 0.0)                              # (Chid, HW)
    hs = im2col(h2)                                                      # (9*Chid, HW)
    y = jnp.dot(w3_ref[...], hs, preferred_element_type=jnp.float32)
    out_ref[0] = y + b3_ref[...]                                         # (Cout, HW)


def _build_tap_masks(H, W):
    """(9, H*W) float32 validity masks for the 3x3 taps ('same' zero padding)."""
    hh, ww = np.meshgrid(np.arange(H), np.arange(W), indexing="ij")
    hh = hh.reshape(-1)
    ww = ww.reshape(-1)
    rows = []
    for dy in (-1, 0, 1):
        for dx in (-1, 0, 1):
            valid = ((hh + dy >= 0) & (hh + dy < H) &
                     (ww + dx >= 0) & (ww + dx < W))
            rows.append(valid.astype(np.float32))
    return np.stack(rows)


def init_convnet_params(key, in_channels, hidden_channels, out_channels):
    """Deterministic init mirroring nn.Conv2d defaults (uniform +-1/sqrt(fan_in))."""
    def conv_params(k, cin, cout, ksz):
        kw, kb = jax.random.split(k)
        fan_in = cin * ksz * ksz
        bound = 1.0 / jnp.sqrt(float(fan_in))
        # created in PyTorch OIHW convention, transposed to HWIO
        w_oihw = jax.random.uniform(kw, (cout, cin, ksz, ksz), jnp.float32, -bound, bound)
        bias = jax.random.uniform(kb, (cout,), jnp.float32, -bound, bound)
        return jnp.transpose(w_oihw, (2, 3, 1, 0)), bias

    k1, k2, k3 = jax.random.split(key, 3)
    w1, b1 = conv_params(k1, in_channels, hidden_channels, 3)
    w2, b2 = conv_params(k2, hidden_channels, hidden_channels, 1)
    w3, b3 = conv_params(k3, hidden_channels, out_channels, 3)
    return dict(w1=w1, b1=b1, w2=w2, b2=b2, w3=w3, b3=b3)


@jax.jit
def convnet_forward(x_nchw, params):
    """Matches ConvNet.forward(inputs) — NCHW in, NCHW out (context is unused)."""
    N, C_in, H, W = x_nchw.shape
    HW = H * W
    C_hid = params["w1"].shape[-1]
    C_out = params["w3"].shape[-1]

    x_flat = x_nchw.astype(jnp.float32).reshape(N, C_in, HW)   # free reshape
    masks = jnp.asarray(_build_tap_masks(H, W))                # compile-time constant

    # Tap-folded weight matrices (Cout, K) and bias columns (C, 1).
    w1 = jnp.transpose(params["w1"].reshape(9 * C_in, C_hid))   # (Chid, 9*Cin)
    w2 = jnp.transpose(params["w2"].reshape(C_hid, C_hid))      # (Chid, Chid)
    w3 = jnp.transpose(params["w3"].reshape(9 * C_hid, C_out))  # (Cout, 9*Chid)
    b1 = params["b1"].reshape(C_hid, 1).astype(jnp.float32)
    b2 = params["b2"].reshape(C_hid, 1).astype(jnp.float32)
    b3 = params["b3"].reshape(C_out, 1).astype(jnp.float32)

    def _whole(arr):
        r = arr.ndim
        return pl.BlockSpec(arr.shape, lambda n, r=r: (0,) * r)

    out = pl.pallas_call(
        functools.partial(_convnet_kernel, H=H, W=W),
        out_shape=jax.ShapeDtypeStruct((N, C_out, HW), jnp.float32),
        grid=(N,),
        in_specs=[
            pl.BlockSpec((1, C_in, HW), lambda n: (n, 0, 0)),   # x: one image per step
            _whole(masks),
            _whole(w1), _whole(b1),
            _whole(w2), _whole(b2),
            _whole(w3), _whole(b3),
        ],
        out_specs=pl.BlockSpec((1, C_out, HW), lambda n: (n, 0, 0)),
        compiler_params=pltpu.CompilerParams(
            dimension_semantics=("parallel",)),
    )(x_flat, masks, w1, b1, w2, b2, w3, b3)

    return out.reshape(N, C_out, H, W)


def convnet_reference(x_nchw, params):
    """Pure-JAX (XLA) reference for numerical validation."""
    x = jnp.transpose(x_nchw, (0, 2, 3, 1)).astype(jnp.float32)
    dn = ("NHWC", "HWIO", "NHWC")

    def conv(z, w, b):
        y = jax.lax.conv_general_dilated(z, w, (1, 1), "SAME", dimension_numbers=dn)
        return y + b.reshape(1, 1, 1, -1)

    h = jax.nn.relu(conv(x, params["w1"], params["b1"]))
    h = jax.nn.relu(conv(h, params["w2"], params["b2"]))
    y = conv(h, params["w3"], params["b3"])
    return jnp.transpose(y, (0, 3, 1, 2))


if __name__ == "__main__":
    batch, in_channels, hidden_channels, out_channels, size = 2, 4, 32, 8, 16

    key = jax.random.PRNGKey(0)
    kx, kp = jax.random.split(key)
    x = jax.random.normal(kx, (batch, in_channels, size, size), jnp.float32)
    params = init_convnet_params(kp, in_channels, hidden_channels, out_channels)

    out = convnet_forward(x, params)
    out = jax.block_until_ready(out)
    assert out.shape == (batch, out_channels, size, size), out.shape

    ref = convnet_reference(x, params)
    err = float(jnp.max(jnp.abs(out - ref)))
    assert jnp.allclose(out, ref, atol=1e-4, rtol=1e-4), f"max abs err {err}"

    print("KERNEL_OK")
</pallas_src>

<mosaic_0001>
module attributes {stable_mosaic.version = 11 : i64} {
  func.func @_convnet_kernel(%arg0: i32, %arg1: memref<1x4x256xf32, #tpu.memory_space<vmem>>, %arg2: memref<9x256xf32, #tpu.memory_space<vmem>>, %arg3: memref<32x36xf32, #tpu.memory_space<vmem>>, %arg4: memref<32x1xf32, #tpu.memory_space<vmem>>, %arg5: memref<32x32xf32, #tpu.memory_space<vmem>>, %arg6: memref<32x1xf32, #tpu.memory_space<vmem>>, %arg7: memref<8x288xf32, #tpu.memory_space<vmem>>, %arg8: memref<8x1xf32, #tpu.memory_space<vmem>>, %arg9: memref<1x8x256xf32, #tpu.memory_space<vmem>>) attributes {dimension_semantics = [#tpu.dimension_semantics<parallel>], iteration_bounds = array<i64: 2>, scalar_prefetch = 0 : i64, scratch_operands = 0 : i64, tpu.core_type = #tpu.core_type<tc>, window_params = [{transform_indices = @transform_0, window_bounds = array<i64: 1, 4, 256>}, {pipeline_mode = #tpu.pipeline_mode<synchronous>, transform_indices = @transform_1, window_bounds = array<i64: 9, 256>}, {pipeline_mode = #tpu.pipeline_mode<synchronous>, transform_indices = @transform_2, window_bounds = array<i64: 32, 36>}, {pipeline_mode = #tpu.pipeline_mode<synchronous>, transform_indices = @transform_3, window_bounds = array<i64: 32, 1>}, {pipeline_mode = #tpu.pipeline_mode<synchronous>, transform_indices = @transform_4, window_bounds = array<i64: 32, 32>}, {pipeline_mode = #tpu.pipeline_mode<synchronous>, transform_indices = @transform_5, window_bounds = array<i64: 32, 1>}, {pipeline_mode = #tpu.pipeline_mode<synchronous>, transform_indices = @transform_6, window_bounds = array<i64: 8, 288>}, {pipeline_mode = #tpu.pipeline_mode<synchronous>, transform_indices = @transform_7, window_bounds = array<i64: 8, 1>}, {transform_indices = @transform_8, window_bounds = array<i64: 1, 8, 256>}]} {
    %c0 = arith.constant 0 : index
    %c0_0 = arith.constant 0 : index
    %c0_1 = arith.constant 0 : index
    %0 = vector.load %arg1[%c0, %c0_0, %c0_1] : memref<1x4x256xf32, #tpu.memory_space<vmem>>, vector<1x4x256xf32>
    %1 = vector.shape_cast %0 : vector<1x4x256xf32> to vector<4x256xf32>
    %2 = vector.extract_strided_slice %1 {offsets = [0, 239], sizes = [4, 17], strides = [1, 1]} : vector<4x256xf32> to vector<4x17xf32>
    %3 = vector.extract_strided_slice %1 {offsets = [0, 0], sizes = [4, 239], strides = [1, 1]} : vector<4x256xf32> to vector<4x239xf32>
    %4 = tpu.concatenate %2, %3 in 1 : vector<4x17xf32>, vector<4x239xf32> -> vector<4x256xf32>
    %c0_2 = arith.constant 0 : index
    %c0_3 = arith.constant 0 : index
    %5 = vector.load %arg2[%c0_2, %c0_3] : memref<9x256xf32, #tpu.memory_space<vmem>>, vector<1x256xf32>
    %6 = vector.broadcast %5 : vector<1x256xf32> to vector<4x256xf32>
    %7 = arith.mulf %4, %6 : vector<4x256xf32>
    %8 = vector.extract_strided_slice %1 {offsets = [0, 240], sizes = [4, 16], strides = [1, 1]} : vector<4x256xf32> to vector<4x16xf32>
    %9 = vector.extract_strided_slice %1 {offsets = [0, 0], sizes = [4, 240], strides = [1, 1]} : vector<4x256xf32> to vector<4x240xf32>
    %10 = tpu.concatenate %8, %9 in 1 : vector<4x16xf32>, vector<4x240xf32> -> vector<4x256xf32>
    %c1 = arith.constant 1 : index
    %c0_4 = arith.constant 0 : index
    %11 = vector.load %arg2[%c1, %c0_4] : memref<9x256xf32, #tpu.memory_space<vmem>>, vector<1x256xf32>
    %12 = vector.broadcast %11 : vector<1x256xf32> to vector<4x256xf32>
    %13 = arith.mulf %10, %12 : vector<4x256xf32>
    %14 = vector.extract_strided_slice %1 {offsets = [0, 241], sizes = [4, 15], strides = [1, 1]} : vector<4x256xf32> to vector<4x15xf32>
    %15 = vector.extract_strided_slice %1 {offsets = [0, 0], sizes = [4, 241], strides = [1, 1]} : vector<4x256xf32> to vector<4x241xf32>
    %16 = tpu.concatenate %14, %15 in 1 : vector<4x15xf32>, vector<4x241xf32> -> vector<4x256xf32>
    %c2 = arith.constant 2 : index
    %c0_5 = arith.constant 0 : index
    %17 = vector.load %arg2[%c2, %c0_5] : memref<9x256xf32, #tpu.memory_space<vmem>>, vector<1x256xf32>
    %18 = vector.broadcast %17 : vector<1x256xf32> to vector<4x256xf32>
    %19 = arith.mulf %16, %18 : vector<4x256xf32>
    %20 = vector.extract_strided_slice %1 {offsets = [0, 255], sizes = [4, 1], strides = [1, 1]} : vector<4x256xf32> to vector<4x1xf32>
    %21 = vector.extract_strided_slice %1 {offsets = [0, 0], sizes = [4, 255], strides = [1, 1]} : vector<4x256xf32> to vector<4x255xf32>
    %22 = tpu.concatenate %20, %21 in 1 : vector<4x1xf32>, vector<4x255xf32> -> vector<4x256xf32>
    %c3 = arith.constant 3 : index
    %c0_6 = arith.constant 0 : index
    %23 = vector.load %arg2[%c3, %c0_6] : memref<9x256xf32, #tpu.memory_space<vmem>>, vector<1x256xf32>
    %24 = vector.broadcast %23 : vector<1x256xf32> to vector<4x256xf32>
    %25 = arith.mulf %22, %24 : vector<4x256xf32>
    %c4 = arith.constant 4 : index
    %c0_7 = arith.constant 0 : index
    %26 = vector.load %arg2[%c4, %c0_7] : memref<9x256xf32, #tpu.memory_space<vmem>>, vector<1x256xf32>
    %27 = vector.broadcast %26 : vector<1x256xf32> to vector<4x256xf32>
    %28 = arith.mulf %1, %27 : vector<4x256xf32>
    %29 = vector.extract_strided_slice %1 {offsets = [0, 1], sizes = [4, 255], strides = [1, 1]} : vector<4x256xf32> to vector<4x255xf32>
    %30 = vector.extract_strided_slice %1 {offsets = [0, 0], sizes = [4, 1], strides = [1, 1]} : vector<4x256xf32> to vector<4x1xf32>
    %31 = tpu.concatenate %29, %30 in 1 : vector<4x255xf32>, vector<4x1xf32> -> vector<4x256xf32>
    %c5 = arith.constant 5 : index
    %c0_8 = arith.constant 0 : index
    %32 = vector.load %arg2[%c5, %c0_8] : memref<9x256xf32, #tpu.memory_space<vmem>>, vector<1x256xf32>
    %33 = vector.broadcast %32 : vector<1x256xf32> to vector<4x256xf32>
    %34 = arith.mulf %31, %33 : vector<4x256xf32>
    %35 = vector.extract_strided_slice %1 {offsets = [0, 15], sizes = [4, 241], strides = [1, 1]} : vector<4x256xf32> to vector<4x241xf32>
    %36 = vector.extract_strided_slice %1 {offsets = [0, 0], sizes = [4, 15], strides = [1, 1]} : vector<4x256xf32> to vector<4x15xf32>
    %37 = tpu.concatenate %35, %36 in 1 : vector<4x241xf32>, vector<4x15xf32> -> vector<4x256xf32>
    %c6 = arith.constant 6 : index
    %c0_9 = arith.constant 0 : index
    %38 = vector.load %arg2[%c6, %c0_9] : memref<9x256xf32, #tpu.memory_space<vmem>>, vector<1x256xf32>
    %39 = vector.broadcast %38 : vector<1x256xf32> to vector<4x256xf32>
    %40 = arith.mulf %37, %39 : vector<4x256xf32>
    %41 = vector.extract_strided_slice %1 {offsets = [0, 16], sizes = [4, 240], strides = [1, 1]} : vector<4x256xf32> to vector<4x240xf32>
    %42 = vector.extract_strided_slice %1 {offsets = [0, 0], sizes = [4, 16], strides = [1, 1]} : vector<4x256xf32> to vector<4x16xf32>
    %43 = tpu.concatenate %41, %42 in 1 : vector<4x240xf32>, vector<4x16xf32> -> vector<4x256xf32>
    %c7 = arith.constant 7 : index
    %c0_10 = arith.constant 0 : index
    %44 = vector.load %arg2[%c7, %c0_10] : memref<9x256xf32, #tpu.memory_space<vmem>>, vector<1x256xf32>
    %45 = vector.broadcast %44 : vector<1x256xf32> to vector<4x256xf32>
    %46 = arith.mulf %43, %45 : vector<4x256xf32>
    %47 = vector.extract_strided_slice %1 {offsets = [0, 17], sizes = [4, 239], strides = [1, 1]} : vector<4x256xf32> to vector<4x239xf32>
    %48 = vector.extract_strided_slice %1 {offsets = [0, 0], sizes = [4, 17], strides = [1, 1]} : vector<4x256xf32> to vector<4x17xf32>
    %49 = tpu.concatenate %47, %48 in 1 : vector<4x239xf32>, vector<4x17xf32> -> vector<4x256xf32>
    %c8 = arith.constant 8 : index
    %c0_11 = arith.constant 0 : index
    %50 = vector.load %arg2[%c8, %c0_11] : memref<9x256xf32, #tpu.memory_space<vmem>>, vector<1x256xf32>
    %51 = vector.broadcast %50 : vector<1x256xf32> to vector<4x256xf32>
    %52 = arith.mulf %49, %51 : vector<4x256xf32>
    %53 = tpu.concatenate %7, %13, %19, %25, %28, %34, %40, %46, %52 in 0 : vector<4x256xf32>, vector<4x256xf32>, vector<4x256xf32>, vector<4x256xf32>, vector<4x256xf32>, vector<4x256xf32>, vector<4x256xf32>, vector<4x256xf32>, vector<4x256xf32> -> vector<36x256xf32>
    %c0_12 = arith.constant 0 : index
    %c0_13 = arith.constant 0 : index
    %54 = vector.load %arg3[%c0_12, %c0_13] : memref<32x36xf32, #tpu.memory_space<vmem>>, vector<32x36xf32>
    %cst = arith.constant dense<0.000000e+00> : vector<32x256xf32>
    %55 = tpu.matmul %54, %53, %cst {dimension_numbers = #tpu.dot_dimension_numbers<[1], [0], [0], [1], [0, 0, 1, 1], [], []>} : vector<32x36xf32>, vector<36x256xf32>, vector<32x256xf32> -> vector<32x256xf32>
    %c0_14 = arith.constant 0 : index
    %c0_15 = arith.constant 0 : index
    %56 = vector.load %arg4[%c0_14, %c0_15] : memref<32x1xf32, #tpu.memory_space<vmem>>, vector<32x1xf32>
    %57 = vector.broadcast %56 : vector<32x1xf32> to vector<32x256xf32>
    %58 = arith.addf %55, %57 : vector<32x256xf32>
    %cst_16 = arith.constant 0.000000e+00 : f32
    %59 = vector.broadcast %cst_16 : f32 to vector<32x256xf32>
    %60 = arith.maximumf %58, %59 : vector<32x256xf32>
    %c0_17 = arith.constant 0 : index
    %c0_18 = arith.constant 0 : index
    %61 = vector.load %arg5[%c0_17, %c0_18] : memref<32x32xf32, #tpu.memory_space<vmem>>, vector<32x32xf32>
    %cst_19 = arith.constant dense<0.000000e+00> : vector<32x256xf32>
    %62 = tpu.matmul %61, %60, %cst_19 {dimension_numbers = #tpu.dot_dimension_numbers<[1], [0], [0], [1], [0, 0, 1, 1], [], []>} : vector<32x32xf32>, vector<32x256xf32>, vector<32x256xf32> -> vector<32x256xf32>
    %c0_20 = arith.constant 0 : index
    %c0_21 = arith.constant 0 : index
    %63 = vector.load %arg6[%c0_20, %c0_21] : memref<32x1xf32, #tpu.memory_space<vmem>>, vector<32x1xf32>
    %64 = vector.broadcast %63 : vector<32x1xf32> to vector<32x256xf32>
    %65 = arith.addf %62, %64 : vector<32x256xf32>
    %cst_22 = arith.constant 0.000000e+00 : f32
    %66 = vector.broadcast %cst_22 : f32 to vector<32x256xf32>
    %67 = arith.maximumf %65, %66 : vector<32x256xf32>
    %68 = vector.extract_strided_slice %67 {offsets = [0, 239], sizes = [32, 17], strides = [1, 1]} : vector<32x256xf32> to vector<32x17xf32>
    %69 = vector.extract_strided_slice %67 {offsets = [0, 0], sizes = [32, 239], strides = [1, 1]} : vector<32x256xf32> to vector<32x239xf32>
    %70 = tpu.concatenate %68, %69 in 1 : vector<32x17xf32>, vector<32x239xf32> -> vector<32x256xf32>
    %c0_23 = arith.constant 0 : index
    %c0_24 = arith.constant 0 : index
    %71 = vector.load %arg2[%c0_23, %c0_24] : memref<9x256xf32, #tpu.memory_space<vmem>>, vector<1x256xf32>
    %72 = vector.broadcast %71 : vector<1x256xf32> to vector<32x256xf32>
    %73 = arith.mulf %70, %72 : vector<32x256xf32>
    %74 = vector.extract_strided_slice %67 {offsets = [0, 240], sizes = [32, 16], strides = [1, 1]} : vector<32x256xf32> to vector<32x16xf32>
    %75 = vector.extract_strided_slice %67 {offsets = [0, 0], sizes = [32, 240], strides = [1, 1]} : vector<32x256xf32> to vector<32x240xf32>
    %76 = tpu.concatenate %74, %75 in 1 : vector<32x16xf32>, vector<32x240xf32> -> vector<32x256xf32>
    %c1_25 = arith.constant 1 : index
    %c0_26 = arith.constant 0 : index
    %77 = vector.load %arg2[%c1_25, %c0_26] : memref<9x256xf32, #tpu.memory_space<vmem>>, vector<1x256xf32>
    %78 = vector.broadcast %77 : vector<1x256xf32> to vector<32x256xf32>
    %79 = arith.mulf %76, %78 : vector<32x256xf32>
    %80 = vector.extract_strided_slice %67 {offsets = [0, 241], sizes = [32, 15], strides = [1, 1]} : vector<32x256xf32> to vector<32x15xf32>
    %81 = vector.extract_strided_slice %67 {offsets = [0, 0], sizes = [32, 241], strides = [1, 1]} : vector<32x256xf32> to vector<32x241xf32>
    %82 = tpu.concatenate %80, %81 in 1 : vector<32x15xf32>, vector<32x241xf32> -> vector<32x256xf32>
    %c2_27 = arith.constant 2 : index
    %c0_28 = arith.constant 0 : index
    %83 = vector.load %arg2[%c2_27, %c0_28] : memref<9x256xf32, #tpu.memory_space<vmem>>, vector<1x256xf32>
    %84 = vector.broadcast %83 : vector<1x256xf32> to vector<32x256xf32>
    %85 = arith.mulf %82, %84 : vector<32x256xf32>
    %86 = vector.extract_strided_slice %67 {offsets = [0, 255], sizes = [32, 1], strides = [1, 1]} : vector<32x256xf32> to vector<32x1xf32>
    %87 = vector.extract_strided_slice %67 {offsets = [0, 0], sizes = [32, 255], strides = [1, 1]} : vector<32x256xf32> to vector<32x255xf32>
    %88 = tpu.concatenate %86, %87 in 1 : vector<32x1xf32>, vector<32x255xf32> -> vector<32x256xf32>
    %c3_29 = arith.constant 3 : index
    %c0_30 = arith.constant 0 : index
    %89 = vector.load %arg2[%c3_29, %c0_30] : memref<9x256xf32, #tpu.memory_space<vmem>>, vector<1x256xf32>
    %90 = vector.broadcast %89 : vector<1x256xf32> to vector<32x256xf32>
    %91 = arith.mulf %88, %90 : vector<32x256xf32>
    %c4_31 = arith.constant 4 : index
    %c0_32 = arith.constant 0 : index
    %92 = vector.load %arg2[%c4_31, %c0_32] : memref<9x256xf32, #tpu.memory_space<vmem>>, vector<1x256xf32>
    %93 = vector.broadcast %92 : vector<1x256xf32> to vector<32x256xf32>
    %94 = arith.mulf %67, %93 : vector<32x256xf32>
    %95 = vector.extract_strided_slice %67 {offsets = [0, 1], sizes = [32, 255], strides = [1, 1]} : vector<32x256xf32> to vector<32x255xf32>
    %96 = vector.extract_strided_slice %67 {offsets = [0, 0], sizes = [32, 1], strides = [1, 1]} : vector<32x256xf32> to vector<32x1xf32>
    %97 = tpu.concatenate %95, %96 in 1 : vector<32x255xf32>, vector<32x1xf32> -> vector<32x256xf32>
    %c5_33 = arith.constant 5 : index
    %c0_34 = arith.constant 0 : index
    %98 = vector.load %arg2[%c5_33, %c0_34] : memref<9x256xf32, #tpu.memory_space<vmem>>, vector<1x256xf32>
    %99 = vector.broadcast %98 : vector<1x256xf32> to vector<32x256xf32>
    %100 = arith.mulf %97, %99 : vector<32x256xf32>
    %101 = vector.extract_strided_slice %67 {offsets = [0, 15], sizes = [32, 241], strides = [1, 1]} : vector<32x256xf32> to vector<32x241xf32>
    %102 = vector.extract_strided_slice %67 {offsets = [0, 0], sizes = [32, 15], strides = [1, 1]} : vector<32x256xf32> to vector<32x15xf32>
    %103 = tpu.concatenate %101, %102 in 1 : vector<32x241xf32>, vector<32x15xf32> -> vector<32x256xf32>
    %c6_35 = arith.constant 6 : index
    %c0_36 = arith.constant 0 : index
    %104 = vector.load %arg2[%c6_35, %c0_36] : memref<9x256xf32, #tpu.memory_space<vmem>>, vector<1x256xf32>
    %105 = vector.broadcast %104 : vector<1x256xf32> to vector<32x256xf32>
    %106 = arith.mulf %103, %105 : vector<32x256xf32>
    %107 = vector.extract_strided_slice %67 {offsets = [0, 16], sizes = [32, 240], strides = [1, 1]} : vector<32x256xf32> to vector<32x240xf32>
    %108 = vector.extract_strided_slice %67 {offsets = [0, 0], sizes = [32, 16], strides = [1, 1]} : vector<32x256xf32> to vector<32x16xf32>
    %109 = tpu.concatenate %107, %108 in 1 : vector<32x240xf32>, vector<32x16xf32> -> vector<32x256xf32>
    %c7_37 = arith.constant 7 : index
    %c0_38 = arith.constant 0 : index
    %110 = vector.load %arg2[%c7_37, %c0_38] : memref<9x256xf32, #tpu.memory_space<vmem>>, vector<1x256xf32>
    %111 = vector.broadcast %110 : vector<1x256xf32> to vector<32x256xf32>
    %112 = arith.mulf %109, %111 : vector<32x256xf32>
    %113 = vector.extract_strided_slice %67 {offsets = [0, 17], sizes = [32, 239], strides = [1, 1]} : vector<32x256xf32> to vector<32x239xf32>
    %114 = vector.extract_strided_slice %67 {offsets = [0, 0], sizes = [32, 17], strides = [1, 1]} : vector<32x256xf32> to vector<32x17xf32>
    %115 = tpu.concatenate %113, %114 in 1 : vector<32x239xf32>, vector<32x17xf32> -> vector<32x256xf32>
    %c8_39 = arith.constant 8 : index
    %c0_40 = arith.constant 0 : index
    %116 = vector.load %arg2[%c8_39, %c0_40] : memref<9x256xf32, #tpu.memory_space<vmem>>, vector<1x256xf32>
    %117 = vector.broadcast %116 : vector<1x256xf32> to vector<32x256xf32>
    %118 = arith.mulf %115, %117 : vector<32x256xf32>
    %119 = tpu.concatenate %73, %79, %85, %91, %94, %100, %106, %112, %118 in 0 : vector<32x256xf32>, vector<32x256xf32>, vector<32x256xf32>, vector<32x256xf32>, vector<32x256xf32>, vector<32x256xf32>, vector<32x256xf32>, vector<32x256xf32>, vector<32x256xf32> -> vector<288x256xf32>
    %c0_41 = arith.constant 0 : index
    %c0_42 = arith.constant 0 : index
    %120 = vector.load %arg7[%c0_41, %c0_42] : memref<8x288xf32, #tpu.memory_space<vmem>>, vector<8x288xf32>
    %cst_43 = arith.constant dense<0.000000e+00> : vector<8x256xf32>
    %121 = tpu.matmul %120, %119, %cst_43 {dimension_numbers = #tpu.dot_dimension_numbers<[1], [0], [0], [1], [0, 0, 1, 1], [], []>} : vector<8x288xf32>, vector<288x256xf32>, vector<8x256xf32> -> vector<8x256xf32>
    %c0_44 = arith.constant 0 : index
    %c0_45 = arith.constant 0 : index
    %122 = vector.load %arg8[%c0_44, %c0_45] : memref<8x1xf32, #tpu.memory_space<vmem>>, vector<8x1xf32>
    %123 = vector.broadcast %122 : vector<8x1xf32> to vector<8x256xf32>
    %124 = arith.addf %121, %123 : vector<8x256xf32>
    %c0_46 = arith.constant 0 : index
    %c0_47 = arith.constant 0 : index
    %c0_48 = arith.constant 0 : index
    %125 = vector.load %arg9[%c0_46, %c0_47, %c0_48] : memref<1x8x256xf32, #tpu.memory_space<vmem>>, vector<1x8x256xf32>
    %126 = vector.shape_cast %125 : vector<1x8x256xf32> to vector<8x256xf32>
    %127 = vector.shape_cast %124 : vector<8x256xf32> to vector<1x8x256xf32>
    tpu.vector_store %arg9[%c0_46, %c0_47, %c0_48], %127 {strides = array<i32>} : memref<1x8x256xf32, #tpu.memory_space<vmem>>, vector<1x8x256xf32>,
    return
  }
  func.func @transform_0(%arg0: i32) -> (i32, i32, i32) {
    %c0_i32 = arith.constant 0 : i32
    %c0_i32_0 = arith.constant 0 : i32
    %c0_i32_1 = arith.constant 0 : i32
    return %arg0, %c0_i32, %c0_i32_0 : i32, i32, i32
  }
  func.func @transform_1(%arg0: i32) -> (i32, i32) {
    %c0_i32 = arith.constant 0 : i32
    %c0_i32_0 = arith.constant 0 : i32
    %c0_i32_1 = arith.constant 0 : i32
    return %c0_i32, %c0_i32_0 : i32, i32
  }
  func.func @transform_2(%arg0: i32) -> (i32, i32) {
    %c0_i32 = arith.constant 0 : i32
    %c0_i32_0 = arith.constant 0 : i32
    %c0_i32_1 = arith.constant 0 : i32
    return %c0_i32, %c0_i32_0 : i32, i32
  }
  func.func @transform_3(%arg0: i32) -> (i32, i32) {
    %c0_i32 = arith.constant 0 : i32
    %c0_i32_0 = arith.constant 0 : i32
    %c0_i32_1 = arith.constant 0 : i32
    return %c0_i32, %c0_i32_0 : i32, i32
  }
  func.func @transform_4(%arg0: i32) -> (i32, i32) {
    %c0_i32 = arith.constant 0 : i32
    %c0_i32_0 = arith.constant 0 : i32
    %c0_i32_1 = arith.constant 0 : i32
    return %c0_i32, %c0_i32_0 : i32, i32
  }
  func.func @transform_5(%arg0: i32) -> (i32, i32) {
    %c0_i32 = arith.constant 0 : i32
    %c0_i32_0 = arith.constant 0 : i32
    %c0_i32_1 = arith.constant 0 : i32
    return %c0_i32, %c0_i32_0 : i32, i32
  }
  func.func @transform_6(%arg0: i32) -> (i32, i32) {
    %c0_i32 = arith.constant 0 : i32
    %c0_i32_0 = arith.constant 0 : i32
    %c0_i32_1 = arith.constant 0 : i32
    return %c0_i32, %c0_i32_0 : i32, i32
  }
  func.func @transform_7(%arg0: i32) -> (i32, i32) {
    %c0_i32 = arith.constant 0 : i32
    %c0_i32_0 = arith.constant 0 : i32
    %c0_i32_1 = arith.constant 0 : i32
    return %c0_i32, %c0_i32_0 : i32, i32
  }
  func.func @transform_8(%arg0: i32) -> (i32, i32, i32) {
    %c0_i32 = arith.constant 0 : i32
    %c0_i32_0 = arith.constant 0 : i32
    %c0_i32_1 = arith.constant 0 : i32
    return %arg0, %c0_i32, %c0_i32_0 : i32, i32, i32
  }
}

</mosaic_0001>

<bundles_post_ra>
// kernel: convnet_forward.1
= control target key start
LH: loop header
LB: loop body
LE: loop exit
PB: predicated region body
PF: predicated region fallthrough
CT: control target
= control target key end

     0   :  { %s1465_s27 = smov 0   ;;  %s2211_s0 = inlined_call_operand.vmem [shape: f32[2,4,256], index: 0, kind: input, shape index: {}]   ;;  %s2212_s1 = inlined_call_operand.vmem [shape: f32[9,256], index: 1, kind: input, shape index: {}]   ;;  %s2213_s2 = inlined_call_operand.vmem [shape: f32[32,36], index: 2, kind: input, shape index: {}]   ;;  %s2214_s3 = inlined_call_operand.vmem [shape: f32[32,1], index: 3, kind: input, shape index: {}]   ;;  %s2215_s4 = inlined_call_operand.vmem [shape: f32[32,32], index: 4, kind: input, shape index: {}]   ;;  %s2216_s5 = inlined_call_operand.vmem [shape: f32[32,1], index: 5, kind: input, shape index: {}]   ;;  %s2217_s6 = inlined_call_operand.vmem [shape: f32[8,288], index: 6, kind: input, shape index: {}]   ;;  %s2218_s7 = inlined_call_operand.vmem [shape: f32[8,1], index: 7, kind: input, shape index: {}]   ;;  %s2219_s8 = inlined_call_operand.vmem [shape: f32[2,8,256], index: 8, kind: output, shape index: {}]  }
   0x1 LB: > { %s1342_s28 = sadd.s32 4294967295, %s1409_s27   ;;  %p1346_p0 = scmp.ge.s32.totalorder %s1409_s27, 1  ;;  %s1409_s27 = sphi %s1465_s27, %s18_s27  }
   0x2   : > { %p262_p1 = scmp.lt.s32.totalorder %s1409_s27, 3 }
   0x4   : > { %p263_p2 = pnand %p1346_p0, %p262_p1 }
   0x6   : > { %266 = sbr.rel (%p263_p2) target bundleno = 985 (0x3d9), region = 52 }
   0xb   : > { %p296_p3 = scmp.lt.s32.totalorder %s1342_s28, 1  ;;  %s1411_s11 = smov 16   ;;  %v1354_v26 = vld [vmem:[%s2212_s1 + $0x4] ss:$8 sm:$0x3]  ;;  %vm417_vm0 = vcmask 1043456  }
   0xc   : > { %s1412_s12 = smov 15   ;;  %s1413_s13 = smov 1   ;;  %v1535_v27 = vperm.slane %v1354_v26, 1  ;;  %v1539_v29 = vperm.slane %v1354_v26, 0  ;;  %v569_v48 = vld [vmem:[%s2214_s3 + $0x10] sm:$0xff]  ;;  %vm506_vm1 = vcmask 908288  }
   0xd   : > { %s2281_s28 = smov (!%p296_p3, %s1342_s28), 1  ;;  %s1414_s14 = smov 127   ;;  %v1358_v46 = vld [vmem:[%s2212_s1 + $0x10] ss:$8 sm:$0x3]  ;;  %v1419_v50 = vmov 0  }
   0xe   : > { %s1381_s29 = sshll.u32 %s2281_s28, 3  ;;  %s1415_s15 = smov 113   ;;  %v416_v30 = vrot.slane %v1535_v27, 4  ;;  %v1565_v49 = vperm.slane %v1358_v46, 1  ;;  %1401 = vset.pattern.permute.xlu1 %v1419_v50  ;;  %1400 = vset.pattern.permute.xlu0 %v1419_v50  ;;  %vm428_vm2 = vcmask 1039360   ;;  %vm397_vm3 = vcmask 7168  }
   0xf   : > { %s300_s10 = scalar_lea.vmem %s2211_s0, %s1381_s29  ;;  %s1416_s16 = smov 112   ;;  %1402 = vset.pattern.permute.xlu2 %v1419_v50  ;;  %v1355_v52 = vld [vmem:[%s2212_s1 + $0x5] ss:$8 sm:$0x3]  ;;  %vm454_vm4 = vcmask 924672   ;;  %vm480_vm5 = vcmask 916480  }
  0x10   : > { %v1479_v0 = vld [vmem:[%s300_s10] sm:$0xff]  ;;  %s1417_s17 = smov 111   ;;  %s1418_s18 = smov 17   ;;  %v418_v32 = vsel %vm417_vm0, %v1539_v29, %v416_v30  ;;  %2240 = vst [vmem:[#allocation2_spill] sm:$0xff] %v1565_v49  ;;  %v1579_v58 = vperm.slane %v1355_v52, 1  ;;  %vm371_vm6 = vcmask 121856  }
  0x11   : > { %308 = vst [vmem:[#allocation1] ss:$2 sm:$0xff] %v1479_v0  ;;  %v420_v33 = vmul.f32 %v418_v32, %v1479_v0  ;;  %v1353_v55 = vld [vmem:[%s2212_s1 + $0x3] ss:$8 sm:$0x3]  ;;  %vm345_vm7 = vcmask 130048  }
  0x12   : > { %v1357_v56 = vld [vmem:[%s2212_s1 + $0x7] ss:$8 sm:$0x3]  ;;  %v1352_v59 = vld [vmem:[%s2212_s1 + $0x2] ss:$8 sm:$0x3] }
  0x13   : > { %v1356_v61 = vld [vmem:[%s2212_s1 + $0x6] ss:$8 sm:$0x3]  ;;  %v1589_v62 = vperm.slane %v1353_v55, 1  ;;  %v1591_v63 = vperm.slane %v1357_v56, 1  ;;  %vm320_vm8 = vcmask 138240  }
  0x14   : > { %vm591_vm9 = vcmask 293888   ;;  %vm704_vm10 = vcmask 261120   ;;  %s1382_s21 = sshll.u32 %s2281_s28, 4 }
  0x15   : > { %s305_s24 = scalar_lea.vmem %s2219_s8, %s1382_s21 }
  0x18   : > { %v1482_v1 = vld.sshfl [vmem:[#allocation1 + $0x8] sm:$0xff pattern:$0x75316420] }
  0x19   : > { %313 = vst [vmem:[#allocation1] ss:$2 sm:$0xff] %v1479_v0 }
  0x20   : > { %v1485_v2 = vld.sshfl [vmem:[#allocation1] sm:$0xff pattern:$0x75316420]  ;;  %v1487_v3 = vld.sshfl [vmem:[#allocation1 + $0x8] sm:$0xff pattern:$0x75316420] }
  0x21   : > { %333 = vst [vmem:[#allocation1] ss:$2 sm:$0xff] %v1479_v0 }
  0x28   : > { %v334_v4 = vld.sshfl [vmem:[#allocation1 + $0x8] sm:$0xff pattern:$0x75316420] }
  0x29   : > { %335 = vrot.lane.b32.xlu0 %v334_v4, %s1411_s11  ;;  %338 = vst [vmem:[#allocation1] ss:$2 sm:$0xff] %v1479_v0 }
  0x30   : > { %v339_v5 = vld.sshfl [vmem:[#allocation1] sm:$0xff pattern:$0x75316420]  ;;  %v340_v6 = vld.sshfl [vmem:[#allocation1 + $0x8] sm:$0xff pattern:$0x75316420] }
  0x31   : > { %341 = vrot.lane.b32.xlu1 %v339_v5, %s1411_s11  ;;  %359 = vst [vmem:[#allocation1] ss:$2 sm:$0xff] %v1479_v0  ;;  %343 = vrot.lane.b32.xlu2 %v340_v6, %s1411_s11  ;;  %v1600_v6 = vperm.slane %v1352_v59, 1 }
  0x38   : > { %v360_v7 = vld.sshfl [vmem:[#allocation1 + $0x8] sm:$0xff pattern:$0x75316420] }
  0x39   : > { %361 = vrot.lane.b32.xlu0 %v360_v7, %s1412_s12  ;;  %364 = vst [vmem:[#allocation1] ss:$2 sm:$0xff] %v1479_v0 }
  0x40   : > { %v365_v8 = vld.sshfl [vmem:[#allocation1] sm:$0xff pattern:$0x75316420]  ;;  %v366_v9 = vld.sshfl [vmem:[#allocation1 + $0x8] sm:$0xff pattern:$0x75316420] }
  0x41   : > { %367 = vrot.lane.b32.xlu1 %v365_v8, %s1412_s12  ;;  %385 = vst [vmem:[#allocation1] ss:$2 sm:$0xff] %v1479_v0  ;;  %369 = vrot.lane.b32.xlu2 %v366_v9, %s1412_s12  ;;  %v1604_v8 = vperm.slane %v1357_v56, 0 }
  0x48   : > { %v386_v10 = vld.sshfl [vmem:[#allocation1 + $0x8] sm:$0xff pattern:$0x75316420] }
  0x49   : > { %387 = vrot.lane.b32.xlu0 %v386_v10, %s1413_s13  ;;  %390 = vst [vmem:[#allocation1] ss:$2 sm:$0xff] %v1479_v0 }
  0x50   : > { %v391_v11 = vld.sshfl [vmem:[#allocation1] sm:$0xff pattern:$0x75316420]  ;;  %v392_v12 = vld.sshfl [vmem:[#allocation1 + $0x8] sm:$0xff pattern:$0x75316420] }
  0x51   : > { %393 = vrot.lane.b32.xlu1 %v391_v11, %s1413_s13  ;;  %421 = vst [vmem:[#allocation1] ss:$2 sm:$0xff] %v1479_v0  ;;  %395 = vrot.lane.b32.xlu2 %v392_v12, %s1413_s13 }
  0x58   : > { %v422_v13 = vld.sshfl [vmem:[#allocation1] sm:$0xff pattern:$0x75316420]  ;;  %v423_v14 = vld.sshfl [vmem:[#allocation1 + $0x8] sm:$0xff pattern:$0x75316420] }
  0x59   : > { %424 = vrot.lane.b32.xlu0 %v422_v13, %s1414_s14  ;;  %426 = vrot.lane.b32.xlu1 %v423_v14, %s1414_s14  ;;  %432 = vst [vmem:[#allocation1] ss:$2 sm:$0xff] %v1479_v0  ;;  %v1612_v14 = vperm.slane %v1355_v52, 0 }
  0x60   : > { %v433_v15 = vld.sshfl [vmem:[#allocation1] sm:$0xff pattern:$0x75316420] }
  0x61   : > { %447 = vst [vmem:[#allocation1] ss:$2 sm:$0xff] %v1479_v0  ;;  %434 = vrot.lane.b32.xlu2 %v433_v15, %s1414_s14  ;;  %v1351_v15 = vld [vmem:[%s2212_s1 + $0x1] ss:$8 sm:$0x3] }
  0x68   : > { %v448_v16 = vld.sshfl [vmem:[#allocation1] sm:$0xff pattern:$0x75316420]  ;;  %v449_v17 = vld.sshfl [vmem:[#allocation1 + $0x8] sm:$0xff pattern:$0x75316420] }
  0x69   : > { %450 = vrot.lane.b32.xlu0 %v448_v16, %s1415_s15  ;;  %452 = vrot.lane.b32.xlu1 %v449_v17, %s1415_s15  ;;  %458 = vst [vmem:[#allocation1] ss:$2 sm:$0xff] %v1479_v0 }
  0x70   : > { %v459_v18 = vld.sshfl [vmem:[#allocation1] sm:$0xff pattern:$0x75316420] }
  0x71   : > { %473 = vst [vmem:[#allocation1] ss:$2 sm:$0xff] %v1479_v0  ;;  %460 = vrot.lane.b32.xlu2 %v459_v18, %s1415_s15 }
  0x78   : > { %v474_v19 = vld.sshfl [vmem:[#allocation1] sm:$0xff pattern:$0x75316420]  ;;  %v475_v20 = vld.sshfl [vmem:[#allocation1 + $0x8] sm:$0xff pattern:$0x75316420] }
  0x79   : > { %476 = vrot.lane.b32.xlu0 %v474_v19, %s1416_s16  ;;  %484 = vst [vmem:[#allocation1] ss:$2 sm:$0xff] %v1479_v0 }
  0x80   : > { %v485_v21 = vld.sshfl [vmem:[#allocation1] sm:$0xff pattern:$0x75316420] }
  0x81   : > { %478 = vrot.lane.b32.xlu0 %v475_v20, %s1416_s16  ;;  %486 = vrot.lane.b32.xlu1 %v485_v21, %s1416_s16  ;;  %499 = vst [vmem:[#allocation1] ss:$2 sm:$0xff] %v1479_v0  ;;  %v1620_v21 = vperm.slane %v1353_v55, 0 }
  0x88   : > { %v500_v22 = vld.sshfl [vmem:[#allocation1] sm:$0xff pattern:$0x75316420]  ;;  %v501_v23 = vld.sshfl [vmem:[#allocation1 + $0x8] sm:$0xff pattern:$0x75316420] }
  0x89   : > { %502 = vrot.lane.b32.xlu1 %v500_v22, %s1417_s17  ;;  %310 = vrot.lane.b32.xlu0 %v1482_v1, %s1418_s18  ;;  %510 = vst [vmem:[#allocation1] ss:$2 sm:$0xff] %v1479_v0  ;;  %v567_v0 = vld [vmem:[%s2214_s3] sm:$0xff] }
  0x8a   : > { %504 = vrot.lane.b32.xlu2 %v501_v23, %s1417_s17 }
  0x8b   : > { %v1530_v25 = vpop.permute.xlu2 %343 }
  0x90   : > { %v511_v24 = vld.sshfl [vmem:[#allocation1] sm:$0xff pattern:$0x75316420] }
  0x91   : > { %316 = vrot.lane.b32.xlu1 %v1485_v2, %s1418_s18  ;;  %538 = vst [vmem:[#allocation1] ss:$2 sm:$0xff] %v420_v33  ;;  %v1629_v33 = vperm.slane %v1356_v61, 0 }
  0x92   : > { %512 = vrot.lane.b32.xlu2 %v511_v24, %s1417_s17 }
  0x98   : > { %v540_v23 = vld.sshfl [vmem:[#allocation1 + $0x8] sm:$0xff pattern:$0x75316420] }
  0x99   : > { %583 = vperm.xlu1 %1401, %v569_v48  }
  0x9a   : > { %318 = vrot.lane.b32.xlu2 %v1487_v3, %s1418_s18  ;;  %v1598_v3 = vperm.slane %v1356_v61, 1  ;;  %v570_v61 = vld [vmem:[%s2214_s3 + $0x18] sm:$0xff] }
  0x9b   : > { %v1537_v28 = vpop.permute.xlu0 %335  ;;  %v370_v31 = vpop.permute.xlu2 %369  ;;  %588 = vperm.xlu0 %1400, %v570_v61  }
  0xa1   : > { %573 = vperm.xlu1 %1401, %v567_v0   ;;  %v681_v0 = vld [vmem:[%s2216_s5 + $0x8] sm:$0xff] }
  0xa3   : > { %v1545_v34 = vpop.permute.xlu1 %341 }
  0xa4   : > { %v349_v50 = vsel %vm345_vm7, %v1537_v28, %v1545_v34  ;;  %v346_v52 = vsel %vm345_vm7, %v1545_v34, %v1530_v25  ;;  %v325_v28 = vld [vmem:[%s2212_s1] ss:$8 sm:$0x3] }
  0xa9   : > { %691 = vperm.xlu1 %1401, %v681_v0  }
  0xab   : > { %v1547_v35 = vpop.permute.xlu0 %361  ;;  %v396_v36 = vpop.permute.xlu2 %395 }
  0xb3   : > { %v1549_v37 = vpop.permute.xlu1 %367 }
  0xb4   : > { %v372_v10 = vsel %vm371_vm6, %v1549_v37, %v370_v31  ;;  %v1626_v31 = vperm.slane %v1358_v46, 0 }
  0xb5   : > { %v384_v20 = vmul.f32 %v1600_v6, %v372_v10 }
  0xb6   : > { %2241 = vst [vmem:[#allocation3_spill] sm:$0xff] %v1626_v31 }
  0xbb   : > { %v1551_v38 = vpop.permute.xlu0 %387  ;;  %v435_v39 = vpop.permute.xlu2 %434 }
  0xc3   : > { %v394_v40 = vpop.permute.xlu1 %393 }
  0xc4   : > { %v398_v1 = vsel %vm397_vm3, %v394_v40, %v396_v36  ;;  %v401_v24 = vsel %vm397_vm3, %v1551_v38, %v394_v40  ;;  %v1631_v36 = vperm.slane %v1351_v15, 0 }
  0xc5   : > { %v410_v11 = vmul.f32 %v1589_v62, %v398_v1 }
  0xc6   : > { %2242 = vst [vmem:[#allocation4_spill] sm:$0xff] %v1631_v36 }
  0xc7   : > { %v534_v26 = vrot.slane %v410_v11, 4 }
  0xcb   : > { %v425_v41 = vpop.permute.xlu0 %424  ;;  %v461_v42 = vpop.permute.xlu2 %460 }
  0xcc   : > { %v427_v43 = vpop.permute.xlu1 %426 }
  0xcd   : > { %v437_v60 = vsel %vm428_vm2, %v427_v43, %v435_v39  ;;  %v429_v16 = vsel %vm428_vm2, %v425_v41, %v427_v43  ;;  %v1633_v39 = vperm.slane %v1351_v15, 1  ;;  %v409_v43 = vmul.f32 %v1620_v21, %v401_v24  ;;  %v563_v15 = vld [vmem:[%s2213_s2] sm:$0xff]  ;;  %v566_v24 = vld [vmem:[%s2213_s2 + $0x18] sm:$0xff] }
  0xce   : > { %v446_v2 = vmul.f32 %v1579_v58, %v437_v60  ;;  %v445_v32 = vmul.f32 %v1612_v14, %v429_v16 }
  0xcf   : > { %2243 = vst [vmem:[#allocation5_spill] sm:$0xff] %v1633_v39  ;;  %v533_v55 = vrot.slane %v409_v43, 4  ;;  %v358_v25 = vmul.f32 %v1633_v39, %v346_v52 }
  0xd0   : > { %v546_v17 = vrot.slane %v446_v2, 4  ;;  %v568_v2 = vld [vmem:[%s2214_s3 + $0x8] sm:$0xff] }
  0xd1   : > { %578 = vperm.xlu2 %1402, %v568_v2   ;;  %v528_v11 = vrot.slane %v358_v25, 4  ;;  %v676_v2 = vld [vmem:[%s2215_s4] sm:$0xff] }
  0xd2   : > { %v560_v40 = vsel %vm417_vm0, %v540_v23, %v546_v17  ;;  %v565_v23 = vld [vmem:[%s2213_s2 + $0x10] sm:$0xff] }
  0xdb   : > { %v1553_v44 = vpop.permute.xlu0 %450  ;;  %v1560_v47 = vpop.permute.xlu1 %452 }
  0xdc   : > { %v463_v7 = vsel %vm454_vm4, %v1560_v47, %v461_v42  ;;  %v455_v41 = vsel %vm454_vm4, %v1553_v44, %v1560_v47  ;;  %v1639_v42 = vperm.slane %v1352_v59, 0  ;;  %v375_v44 = vsel %vm371_vm6, %v1547_v35, %v1549_v37 }
  0xdd   : > { %v472_v18 = vmul.f32 %v1598_v3, %v463_v7  ;;  %v558_v47 = vsel %vm417_vm0, %v384_v20, %v534_v26  ;;  %v357_v35 = vmul.f32 %v1631_v36, %v349_v50  ;;  %v1666_v59 = vperm.slane %v325_v28, 1  ;;  %v564_v20 = vld [vmem:[%s2213_s2 + $0x8] sm:$0xff] }
  0xde   : > { %v383_v37 = vmul.f32 %v1639_v42, %v375_v44 }
  0xdf   : > { %2245 = vst [vmem:[#allocation7_spill] sm:$0xff] %v1666_v59  ;;  %v527_v10 = vrot.slane %v357_v35, 4 }
  0xe4   : > { %v1555_v45 = vpop.permute.xlu2 %504 }
  0xeb   : > { %v477_v51 = vpop.permute.xlu0 %476 }
  0xec   : > { %v513_v53 = vpop.permute.xlu2 %512 }
  0xed   : > { %v515_v54 = vsel %vm506_vm1, %v1555_v45, %v513_v53  ;;  %v545_v53 = vrot.slane %v445_v32, 4 }
  0xee   : > { %v524_v57 = vmul.f32 %v1565_v49, %v515_v54  ;;  %v539_v54 = vld.sshfl [vmem:[#allocation1] sm:$0xff pattern:$0x75316420] }
  0xef   : > { %v559_v1 = vsel %vm417_vm0, %v539_v54, %v545_v53 }
  0xf0   : > { %1364 = vmatpush.msk.msra.mxu1 %vm417_vm0, %v524_v57  ;;  %v1664_v57 = vperm.slane %v325_v28, 0 }
  0xf2   : > { %2244 = vst [vmem:[#allocation6_spill] sm:$0xff] %v1664_v57 }
  0xf3   : > { %v479_v4 = vpop.permute.xlu0 %478  ;;  %v487_v5 = vpop.permute.xlu1 %486 }
  0xf4   : > { %v489_v9 = vsel %vm480_vm5, %v479_v4, %v487_v5  ;;  %v481_v12 = vsel %vm480_vm5, %v477_v51, %v479_v4  ;;  %v319_v60 = vpop.permute.xlu2 %318 }
  0xf5   : > { %v498_v13 = vmul.f32 %v1591_v63, %v489_v9  ;;  %v497_v22 = vmul.f32 %v1604_v8, %v481_v12  ;;  %v557_v9 = vsel %vm417_vm0, %v383_v37, %v533_v55 }
  0xf7   : > { %v552_v19 = vrot.slane %v498_v13, 4  ;;  %v551_v46 = vrot.slane %v497_v22, 4  ;;  %v680_v22 = vld [vmem:[%s2216_s5] sm:$0xff] }
  0xf9   : > { %v562_v30 = vsel %vm417_vm0, %v472_v18, %v552_v19  ;;  %v682_v18 = vld [vmem:[%s2216_s5 + $0x10] sm:$0xff]  ;;  %v683_v19 = vld [vmem:[%s2216_s5 + $0x18] sm:$0xff] }
  0xfa   : > { %651 = vmatpush.msra.mxu1 %v562_v30  ;;  %696 = vperm.xlu0 %1400, %v682_v18  }
  0xfb   : > { %v503_v38 = vpop.permute.xlu1 %502  ;;  %v311_v34 = vpop.permute.xlu0 %310  ;;  %701 = vperm.xlu2 %1402, %v683_v19  }
  0xfc   : > { %v507_v48 = vsel %vm506_vm1, %v503_v38, %v1555_v45  ;;  %652 = vmatpush.msra.mxu1 %v560_v40  ;;  %v471_v45 = vmul.f32 %v1629_v33, %v455_v41 }
  0xfd   : > { %v523_v51 = vmul.f32 %v1626_v31, %v507_v48 }
  0xfe   : > { %653 = vmatpush.msra.mxu1 %v558_v47  ;;  %v561_v56 = vsel %vm417_vm0, %v471_v45, %v551_v46 }
  0xff   : > { %1359 = vmatpush.msk.msra.mxu0 %vm417_vm0, %v523_v51 }
 0x101   : > { %622 = vmatpush.msra.mxu0 %v561_v56 }
 0x103   : > { %v317_v4 = vpop.permute.xlu1 %316  ;;  %623 = vmatpush.msra.mxu0 %v559_v1  ;;  %686 = vperm.xlu2 %1402, %v680_v22  }
 0x104   : > { %v324_v5 = vsel %vm320_vm8, %v311_v34, %v317_v4  ;;  %v321_v7 = vsel %vm320_vm8, %v317_v4, %v319_v60  ;;  %v677_v4 = vld [vmem:[%s2215_s4 + $0x8] sm:$0xff] }
 0x105   : > { %v331_v12 = vmul.f32 %v1664_v57, %v324_v5  ;;  %v332_v13 = vmul.f32 %v1666_v59, %v321_v7  ;;  %624 = vmatpush.msra.mxu0 %v557_v9  ;;  %v678_v5 = vld [vmem:[%s2215_s4 + $0x10] sm:$0xff]  ;;  %v679_v7 = vld [vmem:[%s2215_s4 + $0x18] sm:$0xff] }
 0x107   : > { %v555_v16 = vsel %vm417_vm0, %v331_v12, %v527_v10  ;;  %v556_v17 = vsel %vm417_vm0, %v332_v13, %v528_v11 }
 0x108   : > { %625 = vmatpush.msra.mxu0 %v555_v16  ;;  %654 = vmatpush.msra.mxu1 %v556_v17 }
 0x109   : > { %1360 = vmatmul.msk.f32.vlgmr.msra.gmra.mxu0 %vm591_vm9, %v563_v15  ;;  %1365 = vmatmul.msk.f32.vlgmr.msra.gmra.mxu1 %vm591_vm9, %v563_v15 }
 0x10b   : > { %v584_v38 = vpop.permute.xlu1 %583 }
 0x10d   : > { %v589_v48 = vpop.permute.xlu0 %588 }
 0x111   : > { %1361 = vmatmul.msk.f32.gmra.mxu0 %vm591_vm9, %v564_v20  ;;  %1366 = vmatmul.msk.f32.gmra.mxu1 %vm591_vm9, %v564_v20 }
 0x113   : > { %v574_v45 = vpop.permute.xlu1 %573 }
 0x119   : > { %1362 = vmatmul.msk.f32.gmra.mxu0 %vm591_vm9, %v565_v23  ;;  %1367 = vmatmul.msk.f32.gmra.mxu1 %vm591_vm9, %v565_v23 }
 0x11b   : > { %v692_v19 = vpop.permute.xlu1 %691 }
 0x121   : > { %1363 = vmatmul.msk.f32.gmra.mxu0 %vm591_vm9, %v566_v24  ;;  %1368 = vmatmul.msk.f32.gmra.mxu1 %vm591_vm9, %v566_v24 }
 0x12b   : > { %v579_v46 = vpop.permute.xlu2 %578 }
 0x155   : > { %v1734_v9 = vpop.permute.xlu2 %701 }
 0x15d   : > { %v687_v10 = vpop.permute.xlu2 %686 }
 0x16c   : > { %v697_v24 = vpop.permute.xlu0 %696 }
 0x186   : > { %v627_v26 = vpop.f32.mrf.mxu0  ;;  %v656_v30 = vpop.f32.mrf.mxu1 }
 0x187   : > { %v628_v55 = vadd.f32 %v627_v26, %v574_v45  ;;  %v657_v56 = vadd.f32 %v656_v30, %v574_v45 }
 0x189   : > { %v668_v0 = vmax.f32 %v628_v55, 0.0  ;;  %v669_v1 = vmax.f32 %v657_v56, 0.0 }
 0x18e   : > { %v630_v32 = vpop.f32.mrf.mxu0  ;;  %v659_v41 = vpop.f32.mrf.mxu1 }
 0x18f   : > { %v631_v28 = vadd.f32 %v630_v32, %v579_v46  ;;  %v660_v54 = vadd.f32 %v659_v41, %v579_v46 }
 0x191   : > { %v670_v60 = vmax.f32 %v631_v28, 0.0  ;;  %v671_v61 = vmax.f32 %v660_v54, 0.0 }
 0x196   : > { %v633_v40 = vpop.f32.mrf.mxu0  ;;  %v662_v43 = vpop.f32.mrf.mxu1 }
 0x197   : > { %v634_v47 = vadd.f32 %v633_v40, %v584_v38  ;;  %v663_v51 = vadd.f32 %v662_v43, %v584_v38 }
 0x199   : > { %v672_v25 = vmax.f32 %v634_v47, 0.0  ;;  %v673_v34 = vmax.f32 %v663_v51, 0.0 }
 0x19e   : > { %v636_v50 = vpop.f32.mrf.mxu0  ;;  %v665_v44 = vpop.f32.mrf.mxu1 }
 0x19f   : > { %v637_v52 = vadd.f32 %v636_v50, %v589_v48  ;;  %v666_v53 = vadd.f32 %v665_v44, %v589_v48 }
 0x1a1   : > { %v674_v35 = vmax.f32 %v637_v52, 0.0  ;;  %v675_v37 = vmax.f32 %v666_v53, 0.0 }
 0x1a3   : > { %729 = vmatpush.msra.mxu2 %v674_v35  ;;  %758 = vmatpush.msra.mxu3 %v675_v37 }
 0x1a5   : > { %730 = vmatpush.msra.mxu2 %v672_v25  ;;  %759 = vmatpush.msra.mxu3 %v673_v34 }
 0x1a7   : > { %731 = vmatpush.msra.mxu2 %v670_v60  ;;  %760 = vmatpush.msra.mxu3 %v671_v61 }
 0x1a9   : > { %732 = vmatpush.msra.mxu2 %v668_v0  ;;  %761 = vmatpush.msra.mxu3 %v669_v1 }
 0x1aa   : > { %1369 = vmatmul.msk.f32.vlgmr.msra.gmra.mxu2 %vm704_vm10, %v676_v2  ;;  %1373 = vmatmul.msk.f32.vlgmr.msra.gmra.mxu3 %vm704_vm10, %v676_v2 }
 0x1b2   : > { %1370 = vmatmul.msk.f32.gmra.mxu2 %vm704_vm10, %v677_v4  ;;  %1374 = vmatmul.msk.f32.gmra.mxu3 %vm704_vm10, %v677_v4 }
 0x1ba   : > { %1371 = vmatmul.msk.f32.gmra.mxu2 %vm704_vm10, %v678_v5  ;;  %1375 = vmatmul.msk.f32.gmra.mxu3 %vm704_vm10, %v678_v5 }
 0x1c2   : > { %1372 = vmatmul.msk.f32.gmra.mxu2 %vm704_vm10, %v679_v7  ;;  %1376 = vmatmul.msk.f32.gmra.mxu3 %vm704_vm10, %v679_v7 }
 0x22d   : > { %v734_v11 = vpop.f32.mrf.mxu2  ;;  %v763_v15 = vpop.f32.mrf.mxu3 }
 0x22e   : > { %v735_v12 = vadd.f32 %v734_v11, %v687_v10  ;;  %v764_v16 = vadd.f32 %v763_v15, %v687_v10 }
 0x230   : > { %v1736_v13 = vmax.f32 %v735_v12, 0.0  ;;  %v1744_v17 = vmax.f32 %v764_v16, 0.0 }
 0x232   : > { %1021 = vrot.lane.b32.xlu0 %v1736_v13, %s1415_s15  ;;  %935 = vrot.lane.b32.xlu1 %v1736_v13, %s1413_s13  ;;  %2246 = vst [vmem:[#allocation8_spill] sm:$0xff] %v1744_v17 }
 0x233   : > { %1065 = vrot.lane.b32.xlu2 %v1736_v13, %s1416_s16 }
 0x235   : > { %v737_v18 = vpop.f32.mrf.mxu2  ;;  %v766_v30 = vpop.f32.mrf.mxu3 }
 0x236   : > { %v738_v20 = vadd.f32 %v737_v18, %v692_v19  ;;  %v767_v41 = vadd.f32 %v766_v30, %v692_v19 }
 0x238   : > { %v1752_v22 = vmax.f32 %v738_v20, 0.0  ;;  %v1780_v38 = vmax.f32 %v767_v41, 0.0 }
 0x23a   : > { %1067 = vrot.lane.b32.xlu0 %v1744_v17, %s1416_s16  ;;  %977 = vrot.lane.b32.xlu1 %v1736_v13, %s1414_s14 }
 0x23b   : > { %891 = vrot.lane.b32.xlu2 %v1736_v13, %s1412_s12 }
 0x23d   : > { %v740_v23 = vpop.f32.mrf.mxu2  ;;  %v769_v48 = vpop.f32.mrf.mxu3 }
 0x23e   : > { %v741_v26 = vadd.f32 %v740_v23, %v697_v24  ;;  %v770_v50 = vadd.f32 %v769_v48, %v697_v24 }
 0x240   : > { %v1772_v32 = vmax.f32 %v741_v26, 0.0  ;;  %v1815_v44 = vmax.f32 %v770_v50, 0.0 }
 0x242   : > { %937 = vrot.lane.b32.xlu0 %v1752_v22, %s1413_s13  ;;  %1069 = vrot.lane.b32.xlu1 %v1752_v22, %s1416_s16 }
 0x243   : > { %847 = vrot.lane.b32.xlu2 %v1736_v13, %s1411_s11 }
 0x245   : > { %v743_v40 = vpop.f32.mrf.mxu2  ;;  %v772_v53 = vpop.f32.mrf.mxu3 }
 0x246   : > { %v744_v43 = vadd.f32 %v743_v40, %v1734_v9  ;;  %v773_v45 = vadd.f32 %v772_v53, %v1734_v9 }
 0x248   : > { %v1807_v46 = vmax.f32 %v744_v43, 0.0  ;;  %v1844_v37 = vmax.f32 %v773_v45, 0.0 }
 0x24a   : > { %923 = vrot.lane.b32.xlu0 %v1744_v17, %s1413_s13  ;;  %1023 = vrot.lane.b32.xlu1 %v1744_v17, %s1415_s15 }
 0x24b   : > { %1025 = vrot.lane.b32.xlu2 %v1752_v22, %s1415_s15 }
 0x252   : > { %981 = vrot.lane.b32.xlu0 %v1752_v22, %s1414_s14  ;;  %893 = vrot.lane.b32.xlu1 %v1752_v22, %s1412_s12 }
 0x253   : > { %979 = vrot.lane.b32.xlu2 %v1744_v17, %s1414_s14 }
 0x25a   : > { %849 = vrot.lane.b32.xlu0 %v1752_v22, %s1411_s11  ;;  %879 = vrot.lane.b32.xlu1 %v1744_v17, %s1412_s12 }
 0x25b   : > { %1073 = vrot.lane.b32.xlu2 %v1772_v32, %s1416_s16 }
 0x262   : > { %1027 = vrot.lane.b32.xlu0 %v1780_v38, %s1415_s15  ;;  %835 = vrot.lane.b32.xlu1 %v1744_v17, %s1411_s11 }
 0x263   : > { %1071 = vrot.lane.b32.xlu2 %v1780_v38, %s1416_s16 }
 0x26a   : > { %895 = vrot.lane.b32.xlu0 %v1772_v32, %s1412_s12  ;;  %1029 = vrot.lane.b32.xlu1 %v1772_v32, %s1415_s15 }
 0x26b   : > { %939 = vrot.lane.b32.xlu2 %v1772_v32, %s1413_s13 }
 0x272   : > { %881 = vrot.lane.b32.xlu0 %v1780_v38, %s1412_s12  ;;  %983 = vrot.lane.b32.xlu1 %v1780_v38, %s1414_s14 }
 0x273   : > { %925 = vrot.lane.b32.xlu2 %v1780_v38, %s1413_s13 }
 0x27a   : > { %807 = vrot.lane.b32.xlu0 %v1772_v32, %s1418_s18  ;;  %851 = vrot.lane.b32.xlu1 %v1772_v32, %s1411_s11 }
 0x27b   : > { %985 = vrot.lane.b32.xlu2 %v1772_v32, %s1414_s14 }
 0x282   : > { %789 = vrot.lane.b32.xlu0 %v1780_v38, %s1418_s18  ;;  %941 = vrot.lane.b32.xlu1 %v1807_v46, %s1413_s13 }
 0x283   : > { %837 = vrot.lane.b32.xlu2 %v1780_v38, %s1411_s11 }
 0x28a   : > { %1077 = vrot.lane.b32.xlu0 %v1807_v46, %s1416_s16  ;;  %927 = vrot.lane.b32.xlu1 %v1815_v44, %s1413_s13 }
 0x28b   : > { %1031 = vrot.lane.b32.xlu2 %v1815_v44, %s1415_s15 }
 0x28d   : > { %v1066_v47 = vpop.permute.xlu2 %1065 }
 0x292   : > { %1075 = vrot.lane.b32.xlu0 %v1815_v44, %s1416_s16  ;;  %989 = vrot.lane.b32.xlu1 %v1807_v46, %s1414_s14 }
 0x293   : > { %897 = vrot.lane.b32.xlu2 %v1807_v46, %s1412_s12 }
 0x295   : > { %v892_v51 = vpop.permute.xlu2 %891 }
 0x29a   : > { %1033 = vrot.lane.b32.xlu0 %v1807_v46, %s1415_s15  ;;  %809 = vrot.lane.b32.xlu1 %v1807_v46, %s1418_s18 }
 0x29b   : > { %883 = vrot.lane.b32.xlu2 %v1815_v44, %s1412_s12 }
 0x29d   : > { %v1835_v52 = vpop.permute.xlu2 %847 }
 0x2a2   : > { %987 = vrot.lane.b32.xlu0 %v1815_v44, %s1414_s14  ;;  %1121 = vrot.lane.b32.xlu1 %v1807_v46, %s1417_s17 }
 0x2a3   : > { %791 = vrot.lane.b32.xlu2 %v1815_v44, %s1418_s18 }
 0x2a4   : > { %v1022_v28 = vpop.permute.xlu0 %1021  ;;  %v936_v54 = vpop.permute.xlu1 %935 }
 0x2a5   : > { %v1026_v35 = vpop.permute.xlu2 %1025 }
 0x2aa   : > { %853 = vrot.lane.b32.xlu0 %v1807_v46, %s1411_s11  ;;  %1079 = vrot.lane.b32.xlu1 %v1844_v37, %s1416_s16 }
 0x2ab   : > { %1117 = vrot.lane.b32.xlu2 %v1772_v32, %s1417_s17 }
 0x2ac   : > { %v1068_v55 = vpop.permute.xlu0 %1067  ;;  %v978_v56 = vpop.permute.xlu1 %977 }
 0x2ad   : > { %v1853_v25 = vsel %vm480_vm5, %v1066_v47, %v1068_v55  ;;  %v1856_v34 = vsel %vm480_vm5, %v1068_v55, %v1066_v47  ;;  %v980_v60 = vpop.permute.xlu2 %979  ;;  %v1156_v55 = vld [vmem:[%s2218_s7] sm:$0xff] }
 0x2ae   : > { %v1859_v61 = vsel %vm428_vm2, %v978_v56, %v980_v60  ;;  %v1862_v0 = vsel %vm428_vm2, %v980_v60, %v978_v56 }
 0x2b2   : > { %839 = vrot.lane.b32.xlu0 %v1815_v44, %s1411_s11  ;;  %1035 = vrot.lane.b32.xlu1 %v1844_v37, %s1415_s15 }
 0x2b3   : > { %803 = vrot.lane.b32.xlu2 %v1736_v13, %s1418_s18 }
 0x2b4   : > { %v938_v1 = vpop.permute.xlu0 %937  ;;  %v1070_v2 = vpop.permute.xlu1 %1069 }
 0x2b5   : > { %v1870_v4 = vpop.permute.xlu2 %1073 }
 0x2ba   : > { %929 = vrot.lane.b32.xlu0 %v1844_v37, %s1413_s13  ;;  %885 = vrot.lane.b32.xlu1 %v1844_v37, %s1412_s12 }
 0x2bb   : > { %991 = vrot.lane.b32.xlu2 %v1844_v37, %s1414_s14 }
 0x2bc   : > { %v924_v5 = vpop.permute.xlu0 %923  ;;  %v1024_v7 = vpop.permute.xlu1 %1023 }
 0x2bd   : > { %v1879_v9 = vsel %vm397_vm3, %v936_v54, %v924_v5  ;;  %v1882_v10 = vsel %vm397_vm3, %v924_v5, %v936_v54  ;;  %v1885_v11 = vsel %vm454_vm4, %v1022_v28, %v1024_v7  ;;  %v1888_v12 = vsel %vm454_vm4, %v1024_v7, %v1022_v28  ;;  %v1072_v15 = vpop.permute.xlu2 %1071 }
 0x2be   : > { %v1891_v16 = vsel %vm480_vm5, %v1070_v2, %v1072_v15  ;;  %v1894_v18 = vsel %vm480_vm5, %v1072_v15, %v1070_v2 }
 0x2c2   : > { %1119 = vrot.lane.b32.xlu0 %v1815_v44, %s1417_s17  ;;  %805 = vrot.lane.b32.xlu1 %v1752_v22, %s1418_s18 }
 0x2c3   : > { %841 = vrot.lane.b32.xlu2 %v1844_v37, %s1411_s11 }
 0x2c4   : > { %v982_v19 = vpop.permute.xlu0 %981  ;;  %v894_v20 = vpop.permute.xlu1 %893 }
 0x2c5   : > { %v1902_v23 = vpop.permute.xlu2 %939 }
 0x2ca   : > { %1113 = vrot.lane.b32.xlu0 %v1752_v22, %s1417_s17  ;;  %787 = vrot.lane.b32.xlu1 %v1744_v17, %s1418_s18 }
 0x2cb   : > { %1123 = vrot.lane.b32.xlu2 %v1844_v37, %s1417_s17 }
 0x2cc   : > { %v850_v24 = vpop.permute.xlu0 %849  ;;  %v880_v26 = vpop.permute.xlu1 %879 }
 0x2cd   : > { %v1911_v30 = vsel %vm371_vm6, %v892_v51, %v880_v26  ;;  %v1914_v41 = vsel %vm371_vm6, %v880_v26, %v892_v51  ;;  %v926_v40 = vpop.permute.xlu2 %925 }
 0x2ce   : > { %2247 = vst [vmem:[#allocation9_spill] sm:$0xff] %v1911_v30  ;;  %v1917_v43 = vsel %vm397_vm3, %v938_v1, %v926_v40  ;;  %v1920_v48 = vsel %vm397_vm3, %v926_v40, %v938_v1 }
 0x2cf   : > { %2248 = vst [vmem:[#allocation10_spill] sm:$0xff] %v1914_v41  ;;  %v1103_v41 = vmul.f32 %v1891_v16, %v1604_v8 }
 0x2d2   : > { %793 = vrot.lane.b32.xlu0 %v1844_v37, %s1418_s18  ;;  %1115 = vrot.lane.b32.xlu1 %v1780_v38, %s1417_s17 }
 0x2d3   : > { %1109 = vrot.lane.b32.xlu2 %v1736_v13, %s1417_s17 }
 0x2d4   : > { %v1028_v50 = vpop.permute.xlu0 %1027  ;;  %v836_v47 = vpop.permute.xlu1 %835 }
 0x2d5   : > { %v1929_v51 = vsel %vm454_vm4, %v1026_v35, %v1028_v50  ;;  %v1932_v53 = vsel %vm454_vm4, %v1028_v50, %v1026_v35  ;;  %v1936_v45 = vsel %vm345_vm7, %v1835_v52, %v836_v47  ;;  %v1940_v28 = vsel %vm345_vm7, %v836_v47, %v1835_v52  ;;  %v1942_v54 = vpop.permute.xlu2 %985 }
 0x2d6   : > { %2249 = vst [vmem:[#allocation11_spill] sm:$0xff] %v1936_v45 }
 0x2d7   : > { %2250 = vst [vmem:[#allocation12_spill] sm:$0xff] %v1940_v28 }
 0x2da   : > { %1111 = vrot.lane.b32.xlu0 %v1744_v17, %s1417_s17  ;;  %1159 = vperm.xlu1 %1401, %v1156_v55  }
 0x2dc   : > { %v1949_v35 = vpop.permute.xlu0 %895  ;;  %v1030_v56 = vpop.permute.xlu1 %1029 }
 0x2dd   : > { %v838_v60 = vpop.permute.xlu2 %837 }
 0x2de   : > { %v1952_v1 = vsel %vm345_vm7, %v850_v24, %v838_v60  ;;  %v1955_v52 = vsel %vm345_vm7, %v838_v60, %v850_v24 }
 0x2df   : > { %2251 = vst [vmem:[#allocation13_spill] sm:$0xff] %v1952_v1 }
 0x2e0   : > { %2252 = vst [vmem:[#allocation14_spill] sm:$0xff] %v1955_v52 }
 0x2e4   : > { %v882_v2 = vpop.permute.xlu0 %881  ;;  %v984_v5 = vpop.permute.xlu1 %983 }
 0x2e5   : > { %v1958_v7 = vsel %vm371_vm6, %v894_v20, %v882_v2  ;;  %v1961_v15 = vsel %vm371_vm6, %v882_v2, %v894_v20  ;;  %v1964_v26 = vsel %vm428_vm2, %v982_v19, %v984_v5  ;;  %v1967_v40 = vsel %vm428_vm2, %v984_v5, %v982_v19  ;;  %v1032_v50 = vpop.permute.xlu2 %1031 }
 0x2ec   : > { %v1969_v47 = vpop.permute.xlu0 %807  ;;  %v1971_v55 = vpop.permute.xlu1 %851 }
 0x2ed   : > { %2253 = vst [vmem:[#allocation15_spill] sm:$0xff] %v1969_v47  ;;  %v1973_v24 = vpop.permute.xlu2 %897 }
 0x2ee   : > { %2254 = vst [vmem:[#allocation16_spill] sm:$0xff] %v1971_v55 }
 0x2f4   : > { %v1975_v60 = vpop.permute.xlu0 %789  ;;  %v1977_v31 = vpop.permute.xlu1 %941 }
 0x2f5   : > { %2255 = vst [vmem:[#allocation17_spill] sm:$0xff] %v1975_v60  ;;  %v1979_v59 = vpop.permute.xlu2 %883 }
 0x2fc   : > { %v1078_v20 = vpop.permute.xlu0 %1077  ;;  %v928_v2 = vpop.permute.xlu1 %927 }
 0x2fd   : > { %v1981_v28 = vpop.permute.xlu2 %791 }
 0x2fe   : > { %2256 = vst [vmem:[#allocation18_spill] sm:$0xff] %v1981_v28 }
 0x304   : > { %v1076_v57 = vpop.permute.xlu0 %1075  ;;  %v990_v45 = vpop.permute.xlu1 %989 }
 0x305   : > { %v1985_v47 = vpop.permute.xlu2 %1117  ;;  %v1083_v49 = vsel %vm480_vm5, %v1870_v4, %v1076_v57  ;;  %v1099_v55 = vsel %vm480_vm5, %v1076_v57, %v1870_v4  ;;  %v1104_v57 = vmul.f32 %v1894_v18, %v1591_v63  ;;  %v1055_v18 = vsel %vm454_vm4, %v1032_v50, %v1030_v56 }
 0x306   : > { %2258 = vst [vmem:[#allocation20_spill] sm:$0xff] %v1985_v47  ;;  %v1106_v47 = vmul.f32 %v1099_v55, %v1591_v63 }
 0x30c   : > { %v1034_v19 = vpop.permute.xlu0 %1033  ;;  %v1983_v5 = vpop.permute.xlu1 %809 }
 0x30d   : > { %2257 = vst [vmem:[#allocation19_spill] sm:$0xff] %v1983_v5  ;;  %v1989_v39 = vpop.permute.xlu2 %803 }
 0x30e   : > { %2259 = vst [vmem:[#allocation21_spill] sm:$0xff] %v1989_v39  ;;  %v1105_v39 = vmul.f32 %v1083_v49, %v1604_v8  ;;  %v1102_v49 = vmul.f32 %v1856_v34, %v1591_v63 }
 0x314   : > { %v988_v1 = vpop.permute.xlu0 %987  ;;  %v1987_v52 = vpop.permute.xlu1 %1121 }
 0x315   : > { %v992_v4 = vpop.permute.xlu2 %991 }
 0x316   : > { %v996_v34 = vsel %vm428_vm2, %v990_v45, %v992_v4  ;;  %v1012_v55 = vsel %vm428_vm2, %v992_v4, %v990_v45  ;;  %v1011_v4 = vsel %vm428_vm2, %v988_v1, %v1942_v54 }
 0x31c   : > { %v1991_v60 = vpop.permute.xlu0 %853  ;;  %v1080_v36 = vpop.permute.xlu1 %1079 }
 0x31d   : > { %v1084_v28 = vsel %vm480_vm5, %v1078_v20, %v1080_v36  ;;  %v1100_v5 = vsel %vm480_vm5, %v1080_v36, %v1078_v20 }
 0x31e   : > { %v1107_v17 = vmul.f32 %v1084_v28, %v1604_v8  ;;  %v1108_v30 = vmul.f32 %v1100_v5, %v1591_v63  ;;  %v1062_v63 = vmul.f32 %v1055_v18, %v1598_v3  ;;  %v1057_v5 = vmul.f32 %v1885_v11, %v1629_v33 }
 0x31f   : > { %v1019_v11 = vmul.f32 %v996_v34, %v1612_v14 }
 0x320   : > { %1185 = vmatpush.msrb.mxu3 %v1107_v17  ;;  %1245 = vmatpush.msrb.mxu2 %v1108_v30  ;;  %v1101_v17 = vmul.f32 %v1853_v25, %v1604_v8  ;;  %v1059_v25 = vmul.f32 %v1929_v51, %v1629_v33  ;;  %v1058_v51 = vmul.f32 %v1888_v12, %v1598_v3 }
 0x322   : > { %1186 = vmatpush.msrb.mxu3 %v1105_v39  ;;  %1246 = vmatpush.msrb.mxu2 %v1106_v47  ;;  %v1039_v39 = vsel %vm454_vm4, %v1030_v56, %v1032_v50  ;;  %v1060_v56 = vmul.f32 %v1932_v53, %v1598_v3  ;;  %v945_v50 = vsel %vm397_vm3, %v1902_v23, %v928_v2 }
 0x323   : > { %v1061_v8 = vmul.f32 %v1039_v39, %v1629_v33  ;;  %v995_v53 = vsel %vm428_vm2, %v1942_v54, %v988_v1  ;;  %v964_v54 = vmul.f32 %v945_v50, %v1589_v62  ;;  %v1018_v1 = vmul.f32 %v1011_v4, %v1579_v58  ;;  %v1154_v4 = vld [vmem:[%s2217_s6 + $0x8] sm:$0xff] }
 0x324   : > { %v2007_v36 = vpop.permute.xlu0 %839  ;;  %v1036_v28 = vpop.permute.xlu1 %1035  ;;  %1187 = vmatpush.msrb.mxu3 %v1103_v41  ;;  %1247 = vmatpush.msrb.mxu2 %v1104_v57  ;;  %v957_v57 = vsel %vm397_vm3, %v928_v2, %v1902_v23  ;;  %v1020_v23 = vmul.f32 %v1012_v55, %v1579_v58  ;;  %v1017_v2 = vmul.f32 %v995_v53, %v1612_v14  ;;  %v2263_v55 = vld [vmem:[#allocation8_spill] sm:$0xff] }
 0x325   : > { %v1040_v30 = vsel %vm454_vm4, %v1034_v19, %v1036_v28  ;;  %v1056_v16 = vsel %vm454_vm4, %v1036_v28, %v1034_v19 }
 0x326   : > { %1188 = vmatpush.msrb.mxu3 %v1101_v17  ;;  %1248 = vmatpush.msrb.mxu2 %v1102_v49  ;;  %v1063_v47 = vmul.f32 %v1040_v30, %v1629_v33  ;;  %v1064_v41 = vmul.f32 %v1056_v16, %v1598_v3  ;;  %v2043_v33 = vpop.permute.xlu2 %841  ;;  %v961_v17 = vmul.f32 %v1920_v48, %v1620_v21 }
 0x327   : > { %v1015_v49 = vmul.f32 %v1964_v26, %v1612_v14  ;;  %v962_v30 = vmul.f32 %v1917_v43, %v1589_v62  ;;  %v1016_v48 = vmul.f32 %v1967_v40, %v1579_v58  ;;  %v959_v26 = vmul.f32 %v1882_v10, %v1620_v21 }
 0x328   : > { %1189 = vmatpush.msrb.mxu3 %v1063_v47  ;;  %1249 = vmatpush.msrb.mxu2 %v1064_v41  ;;  %v913_v41 = vsel %vm371_vm6, %v1979_v59, %v1949_v35  ;;  %v1013_v43 = vmul.f32 %v1859_v61, %v1612_v14  ;;  %v975_v40 = vmul.f32 %v1807_v46, %v1539_v29 }
 0x329   : > { %v969_v46 = vmul.f32 %v1736_v13, %v1539_v29  ;;  %v918_v13 = vmul.f32 %v1958_v7, %v1600_v6  ;;  %v2261_v7 = vld [vmem:[#allocation20_spill] sm:$0xff] }
 0x32a   : > { %1190 = vmatpush.msrb.mxu3 %v1061_v8  ;;  %1250 = vmatpush.msrb.mxu2 %v1062_v63  ;;  %v901_v8 = vsel %vm371_vm6, %v1949_v35, %v1979_v59  ;;  %v919_v59 = vmul.f32 %v913_v41, %v1639_v42  ;;  %v971_v35 = vmul.f32 %v1752_v22, %v1539_v29 }
 0x32b   : > { %v972_v63 = vmul.f32 %v1780_v38, %v1535_v27 }
 0x32c   : > { %v930_v20 = vpop.permute.xlu0 %929  ;;  %v886_v19 = vpop.permute.xlu1 %885  ;;  %1191 = vmatpush.msrb.mxu3 %v1059_v25  ;;  %1251 = vmatpush.msrb.mxu2 %v1060_v56  ;;  %v2260_v25 = vld [vmem:[#allocation10_spill] sm:$0xff]  ;;  %v2262_v56 = vld [vmem:[#allocation9_spill] sm:$0xff] }
 0x32d   : > { %v946_v28 = vsel %vm397_vm3, %v1977_v31, %v930_v20  ;;  %v958_v45 = vsel %vm397_vm3, %v930_v20, %v1977_v31  ;;  %v963_v31 = vmul.f32 %v957_v57, %v1620_v21  ;;  %v914_v39 = vsel %vm371_vm6, %v886_v19, %v1973_v24  ;;  %v2264_v20 = vld [vmem:[#allocation16_spill] sm:$0xff] }
 0x32e   : > { %1192 = vmatpush.msrb.mxu3 %v1057_v5  ;;  %v965_v3 = vmul.f32 %v958_v45, %v1620_v21  ;;  %v966_v12 = vmul.f32 %v946_v28, %v1589_v62  ;;  %1252 = vmatpush.msrb.mxu2 %v1058_v51  ;;  %v902_v16 = vsel %vm371_vm6, %v1973_v24, %v886_v19  ;;  %v2087_v61 = vpop.permute.xlu2 %1123  ;;  %v2265_v5 = vld [vmem:[#allocation2_spill] sm:$0xff]  ;;  %v2266_v57 = vld [vmem:[#allocation4_spill] sm:$0xff] }
 0x32f   : > { %v960_v24 = vmul.f32 %v1879_v9, %v1589_v62  ;;  %v1014_v21 = vmul.f32 %v1862_v0, %v1579_v58  ;;  %v921_v10 = vmul.f32 %v914_v39, %v1639_v42  ;;  %v922_v14 = vmul.f32 %v902_v16, %v1600_v6 }
 0x330   : > { %1165 = vmatpush.msrb.mxu0 %v965_v3  ;;  %1193 = vmatpush.msrb.mxu3 %v1019_v11  ;;  %v976_v62 = vmul.f32 %v1844_v37, %v1535_v27  ;;  %v973_v58 = vmul.f32 %v1772_v32, %v1539_v29  ;;  %v920_v0 = vmul.f32 %v901_v8, %v1600_v6 }
 0x331   : > { %1225 = vmatpush.msrb.mxu1 %v966_v12  ;;  %1253 = vmatpush.msrb.mxu2 %v1020_v23  ;;  %v974_v9 = vmul.f32 %v1815_v44, %v1535_v27  ;;  %v917_v37 = vmul.f32 %v1961_v15, %v1639_v42  ;;  %v1144_v32 = vsel %vm506_vm1, %v2087_v61, %v1987_v52  ;;  %v2269_v23 = vld [vmem:[#allocation13_spill] sm:$0xff] }
 0x332   : > { %1166 = vmatpush.msrb.mxu0 %v963_v31  ;;  %1194 = vmatpush.msrb.mxu3 %v1017_v2  ;;  %v858_v44 = vsel %vm345_vm7, %v1991_v60, %v2043_v33  ;;  %v870_v29 = vsel %vm345_vm7, %v2043_v33, %v1991_v60  ;;  %v915_v34 = vmul.f32 %v2260_v25, %v1639_v42  ;;  %v2268_v33 = vld [vmem:[#allocation14_spill] sm:$0xff]  ;;  %v2270_v2 = vld [vmem:[#allocation12_spill] sm:$0xff] }
 0x333   : > { %1226 = vmatpush.msrb.mxu1 %v964_v54  ;;  %1254 = vmatpush.msrb.mxu2 %v1018_v1  ;;  %v916_v50 = vmul.f32 %v2262_v56, %v1600_v6  ;;  %v970_v60 = vmul.f32 %v2263_v55, %v1535_v27  ;;  %v857_v19 = vsel %vm345_vm7, %v2264_v20, %v2007_v36  ;;  %v2267_v6 = vld [vmem:[#allocation5_spill] sm:$0xff]  ;;  %v2271_v1 = vld [vmem:[#allocation19_spill] sm:$0xff] }
 0x334   : > { %v2063_v18 = vpop.permute.xlu0 %1119  ;;  %v2065_v47 = vpop.permute.xlu1 %805  ;;  %1167 = vmatpush.msrb.mxu0 %v961_v17  ;;  %1195 = vmatpush.msrb.mxu3 %v1015_v49  ;;  %v869_v42 = vsel %vm345_vm7, %v2007_v36, %v2264_v20  ;;  %v1152_v51 = vmul.f32 %v1144_v32, %v2265_v5  ;;  %v877_v53 = vmul.f32 %v870_v29, %v2266_v57 }
 0x335   : > { %1227 = vmatpush.msrb.mxu1 %v962_v30  ;;  %1255 = vmatpush.msrb.mxu2 %v1016_v48  ;;  %v1143_v38 = vsel %vm506_vm1, %v2063_v18, %v2261_v7  ;;  %v878_v28 = vmul.f32 %v858_v44, %v2267_v6  ;;  %v875_v45 = vmul.f32 %v869_v42, %v2266_v57  ;;  %v2272_v30 = vld [vmem:[#allocation11_spill] sm:$0xff] }
 0x336   : > { %1168 = vmatpush.msrb.mxu0 %v959_v26  ;;  %1196 = vmatpush.msrb.mxu3 %v1013_v43  ;;  %v1150_v27 = vmul.f32 %v1143_v38, %v2265_v5  ;;  %v876_v36 = vmul.f32 %v857_v19, %v2267_v6  ;;  %v873_v3 = vmul.f32 %v2268_v33, %v2266_v57  ;;  %v2273_v48 = vld [vmem:[#allocation15_spill] sm:$0xff]  ;;  %v2274_v26 = vld [vmem:[#allocation18_spill] sm:$0xff] }
 0x337   : > { %1228 = vmatpush.msrb.mxu1 %v960_v24  ;;  %1256 = vmatpush.msrb.mxu2 %v1014_v21  ;;  %v874_v31 = vmul.f32 %v2269_v23, %v2267_v6  ;;  %v871_v54 = vmul.f32 %v2270_v2, %v2266_v57  ;;  %v872_v16 = vmul.f32 %v2272_v30, %v2267_v6  ;;  %v2275_v24 = vld [vmem:[#allocation6_spill] sm:$0xff]  ;;  %v2276_v21 = vld [vmem:[#allocation7_spill] sm:$0xff] }
 0x338   : > { %1169 = vmatpush.msrb.mxu0 %v921_v10  ;;  %1197 = vmatpush.msrb.mxu3 %v975_v40  ;;  %v825_v41 = vsel %vm320_vm8, %v2274_v26, %v2273_v48  ;;  %v813_v40 = vsel %vm320_vm8, %v2273_v48, %v2274_v26  ;;  %v1128_v32 = vsel %vm506_vm1, %v1987_v52, %v2087_v61 }
 0x339   : > { %1229 = vmatpush.msrb.mxu1 %v922_v14  ;;  %1257 = vmatpush.msrb.mxu2 %v976_v62  ;;  %v2277_v14 = vld [vmem:[#allocation17_spill] sm:$0xff]  ;;  %v1127_v25 = vsel %vm506_vm1, %v2261_v7, %v2063_v18 }
 0x33a   : > { %1170 = vmatpush.msrb.mxu0 %v919_v59  ;;  %1198 = vmatpush.msrb.mxu3 %v973_v58  ;;  %v824_v62 = vsel %vm320_vm8, %v2277_v14, %v2065_v47  ;;  %v812_v59 = vsel %vm320_vm8, %v2065_v47, %v2277_v14  ;;  %v831_v58 = vmul.f32 %v825_v41, %v2275_v24  ;;  %v1110_v47 = vpop.permute.xlu2 %1109 }
 0x33b   : > { %1230 = vmatpush.msrb.mxu1 %v920_v0  ;;  %1258 = vmatpush.msrb.mxu2 %v974_v9  ;;  %v2278_v0 = vld [vmem:[#allocation21_spill] sm:$0xff]  ;;  %v832_v9 = vmul.f32 %v813_v40, %v2276_v21 }
 0x33c   : > { %v2116_v22 = vpop.permute.xlu0 %1113  ;;  %v788_v15 = vpop.permute.xlu1 %787  ;;  %1171 = vmatpush.msrb.mxu0 %v917_v37  ;;  %1199 = vmatpush.msrb.mxu3 %v971_v35  ;;  %v829_v35 = vmul.f32 %v824_v62, %v2275_v24 }
 0x33d   : > { %1231 = vmatpush.msrb.mxu1 %v918_v13  ;;  %1259 = vmatpush.msrb.mxu2 %v972_v63  ;;  %v811_v37 = vsel %vm320_vm8, %v2278_v0, %v788_v15  ;;  %v830_v63 = vmul.f32 %v812_v59, %v2276_v21 }
 0x33e   : > { %1172 = vmatpush.msrb.mxu0 %v915_v34  ;;  %1200 = vmatpush.msrb.mxu3 %v969_v46  ;;  %v823_v46 = vsel %vm320_vm8, %v788_v15, %v2278_v0  ;;  %v1153_v15 = vld [vmem:[%s2217_s6] sm:$0xff]  ;;  %v828_v61 = vmul.f32 %v811_v37, %v2276_v21  ;;  %v2279_v34 = vld [vmem:[#allocation3_spill] sm:$0xff] }
 0x33f   : > { %1232 = vmatpush.msrb.mxu1 %v916_v50  ;;  %1260 = vmatpush.msrb.mxu2 %v970_v60  ;;  %v827_v29 = vmul.f32 %v823_v46, %v2275_v24  ;;  %v1151_v38 = vmul.f32 %v1128_v32, %v2279_v34  ;;  %v1155_v50 = vld [vmem:[%s2217_s6 + $0x10] sm:$0xff]  ;;  %v1149_v55 = vmul.f32 %v1127_v25, %v2279_v34 }
 0x340   : > { %1277 = vmatpush.msra.mxu3 %v1152_v51  ;;  %1173 = vmatpush.msrb.mxu0 %v877_v53 }
 0x341   : > { %1233 = vmatpush.msrb.mxu1 %v878_v28  ;;  %1261 = vmatmul.f32.vlgmr.msrb.gmra.mxu2 %v1154_v4 }
 0x342   : > { %1278 = vmatpush.msra.mxu3 %v1150_v27  ;;  %1174 = vmatpush.msrb.mxu0 %v875_v45 }
 0x343   : > { %1234 = vmatpush.msrb.mxu1 %v876_v36  ;;  %1201 = vmatmul.f32.vlgmr.msrb.gmra.mxu3 %v1154_v4 }
 0x344   : > { %v794_v11 = vpop.permute.xlu0 %793  ;;  %v1116_v12 = vpop.permute.xlu1 %1115  ;;  %1175 = vmatpush.msrb.mxu0 %v873_v3 }
 0x345   : > { %v814_v17 = vsel %vm320_vm8, %v2271_v1, %v794_v11  ;;  %v826_v49 = vsel %vm320_vm8, %v794_v11, %v2271_v1  ;;  %v1142_v39 = vsel %vm506_vm1, %v1116_v12, %v2116_v22  ;;  %1235 = vmatpush.msrb.mxu1 %v874_v31  ;;  %v1126_v56 = vsel %vm506_vm1, %v2116_v22, %v1116_v12 }
 0x346   : > { %v1148_v43 = vmul.f32 %v1142_v39, %v2265_v5  ;;  %v833_v8 = vmul.f32 %v826_v49, %v2275_v24  ;;  %v834_v10 = vmul.f32 %v814_v17, %v2276_v21  ;;  %1176 = vmatpush.msrb.mxu0 %v871_v54  ;;  %v1147_v7 = vmul.f32 %v1126_v56, %v2279_v34 }
 0x347   : > { %1236 = vmatpush.msrb.mxu1 %v872_v16 }
 0x348   : > { %1279 = vmatpush.msra.mxu3 %v1148_v43  ;;  %1177 = vmatpush.msrb.mxu0 %v833_v8 }
 0x349   : > { %1237 = vmatpush.msrb.mxu1 %v834_v10 }
 0x34a   : > { %1178 = vmatpush.msrb.mxu0 %v831_v58 }
 0x34b   : > { %1238 = vmatpush.msrb.mxu1 %v832_v9 }
 0x34c   : > { %v1112_v13 = vpop.permute.xlu0 %1111  ;;  %1179 = vmatpush.msrb.mxu0 %v829_v35  ;;  %v1160_v42 = vpop.permute.xlu1 %1159 }
 0x34d   : > { %v1141_v44 = vsel %vm506_vm1, %v1112_v13, %v1110_v47  ;;  %1239 = vmatpush.msrb.mxu1 %v830_v63  ;;  %v1125_v18 = vsel %vm506_vm1, %v1110_v47, %v1112_v13 }
 0x34e   : > { %v1146_v52 = vmul.f32 %v1141_v44, %v2265_v5  ;;  %1180 = vmatpush.msrb.mxu0 %v827_v29  ;;  %v1145_v22 = vmul.f32 %v1125_v18, %v2279_v34 }
 0x34f   : > { %1240 = vmatpush.msrb.mxu1 %v828_v61  ;;  %1181 = vmatmul.f32.vlgmr.msrb.gmra.mxu0 %v1153_v15 }
 0x350   : > { %1217 = vmatpush.msra.mxu0 %v1151_v38  ;;  %1241 = vmatmul.f32.vlgmr.msrb.gmra.mxu1 %v1153_v15 }
 0x351   : > { %1280 = vmatpush.msra.mxu3 %v1146_v52 }
 0x352   : > { %1218 = vmatpush.msra.mxu0 %v1149_v55  ;;  %1378 = vmatmul.msk.f32.vlgmr.msra.gmra.mxu3 %vm704_vm10, %v1155_v50 }
 0x354   : > { %1219 = vmatpush.msra.mxu0 %v1147_v7 }
 0x356   : > { %1220 = vmatpush.msra.mxu0 %v1145_v22 }
 0x357   : > { %1377 = vmatmul.msk.f32.vlgmr.msra.gmra.mxu0 %vm704_vm10, %v1155_v50 }
 0x3c4   : > { %v1262_v57 = vpop.f32.mrf.mxu2 }
 0x3c6   : > { %v1202_v60 = vpop.f32.mrf.mxu3 }
 0x3cc   : > { %v1182_v20 = vpop.f32.mrf.mxu0 }
 0x3cd   : > { %v1242_v19 = vpop.f32.mrf.mxu1  ;;  %v1183_v5 = vadd.f32 %v1182_v20, %v1160_v42 }
 0x3ce   : > { %v1243_v51 = vadd.f32 %v1242_v19, %v1160_v42 }
 0x3cf   : > { %v1203_v53 = vadd.f32 %v1202_v60, %v1183_v5 }
 0x3d0   : > { %v1263_v6 = vadd.f32 %v1262_v57, %v1243_v51 }
 0x3d4   : > { %v1222_v28 = vpop.f32.mrf.mxu0 }
 0x3d5   : > { %v1223_v27 = vadd.f32 %v1222_v28, %v1203_v53  ;;  %v1282_v45 = vpop.f32.mrf.mxu3 }
 0x3d6   : > { %v1283_v36 = vadd.f32 %v1282_v45, %v1263_v6 }
 0x3d7   : > { %1285 = vst [vmem:[%s305_s24] sm:$0xff] %v1223_v27 }
 0x3d8   : > { %1286 = vst [vmem:[%s305_s24 + $0x8] sm:$0xff] %v1283_v36 }
 0x3d9 PF: > { %s18_s27 = sadd.s32 1, %s1409_s27  }
 0x3da   : > { %p15_p4 = scmp.ge.s32.totalorder %s18_s27, 4  }
 0x3dc   :  { %17 = sbr.rel (!%p15_p4) target bundleno = 1 (0x1), region = 90 }

</bundles_post_ra>
